<compile_context>
chip_gen: v7x
topology: tpu7x:2x2x1
jax: 0.10.0
libtpu: 0.0.40
codegen_flags: <defaults>
</compile_context>

<pallas_src>
import jax
import jax.numpy as jnp
from jax.experimental import pallas as pl
from jax.experimental.pallas import tpu as pltpu

SIZE_H1 = 5
SIZE_H2 = 10
SIZE_H3 = 6

LANE = 128          # TPU lane width
BF16_SUBLANE = 16   # bf16 sublane packing (rows per vreg)


def _round_up(n, m):
    return -(-n // m) * m


def _policy_kernel(x_ref,
                   w1_ref, b1_ref,
                   w2_ref, b2_ref,
                   w3_ref, b3_ref,
                   w4_ref, b4_ref,
                   out_ref):
    x = x_ref[...]  # bf16 [TB, d_in_p]

    h1 = jnp.maximum(
        jnp.dot(x, w1_ref[...], preferred_element_type=jnp.float32)
        + b1_ref[...], 0.0)
    h2 = jnp.maximum(
        jnp.dot(h1.astype(jnp.bfloat16), w2_ref[...],
                preferred_element_type=jnp.float32) + b2_ref[...], 0.0)
    h3 = jnp.maximum(
        jnp.dot(h2.astype(jnp.bfloat16), w3_ref[...],
                preferred_element_type=jnp.float32) + b3_ref[...], 0.0)
    # Padded action columns already carry a -1e30 bias => exp underflows to 0,
    # so no explicit mask (iota + select) is needed here.
    logits = (jnp.dot(h3.astype(jnp.bfloat16), w4_ref[...],
                      preferred_element_type=jnp.float32) + b4_ref[...])

    # Numerically-stable softmax over the action (last) axis.
    m = jnp.max(logits, axis=-1, keepdims=True)
    e = jnp.exp(logits - m)
    inv = pl.reciprocal(jnp.sum(e, axis=-1, keepdims=True), approx=True)
    out_ref[...] = (e * inv).astype(out_ref.dtype)


def init_policy_params(key, dim_input, dim_output):
    """Deterministic synthetic parameters (PyTorch Linear-like uniform init)."""
    dims = [(dim_input, SIZE_H1), (SIZE_H1, SIZE_H2),
            (SIZE_H2, SIZE_H3), (SIZE_H3, dim_output)]
    params = []
    for (fan_in, fan_out) in dims:
        key, kw, kb = jax.random.split(key, 3)
        bound = 1.0 / jnp.sqrt(jnp.float32(fan_in))
        w = jax.random.uniform(kw, (fan_in, fan_out), jnp.float32, -bound, bound)
        b = jax.random.uniform(kb, (1, fan_out), jnp.float32, -bound, bound)
        params.extend([w, b])
    return tuple(params)


def _pad_weight(w, k_align=LANE):
    fi, fo = w.shape
    return jnp.pad(w, ((0, _round_up(fi, k_align) - fi),
                       (0, _round_up(fo, LANE) - fo))).astype(jnp.bfloat16)


def _pad_bias(b, pad_value=0.0):
    fo = b.shape[-1]
    return jnp.pad(b.reshape(1, fo),
                   ((0, 0), (0, _round_up(fo, LANE) - fo)),
                   constant_values=pad_value).astype(jnp.float32)


def _pick_batch_tile(batch):
    """Large tiles to amortize per-step overhead; >=2 grid steps when possible
    (keeps both v7x TensorCores busy); bf16 needs 16-row alignment."""
    batch16 = _round_up(batch, BF16_SUBLANE)
    if batch16 <= BF16_SUBLANE:
        return BF16_SUBLANE
    tb = min(2048, _round_up(batch16 // 2, BF16_SUBLANE))
    return max(tb, BF16_SUBLANE)


def policy_forward(s_t, params):
    """Equivalent of Policy.forward: flatten -> 3x(Linear+ReLU) -> Linear -> softmax."""
    w1, b1, w2, b2, w3, b3, w4, b4 = params
    batch = s_t.shape[0]
    dim_output = w4.shape[-1]

    # Flatten and cast once to bf16 (no intermediate f32 materialization).
    x = s_t.reshape(batch, -1).astype(jnp.bfloat16)   # x.view(x.size(0), -1)
    dim_input = x.shape[1]

    # Keep x at its natural feature width (only 16-row sublane alignment for bf16
    # weights' K dim); do NOT inflate to 128 lanes in HBM.
    d_in_p = _round_up(dim_input, BF16_SUBLANE)
    d_out_p = _round_up(dim_output, LANE)

    tb = _pick_batch_tile(batch)
    batch_p = _round_up(batch, tb)

    x_p = jnp.pad(x, ((0, batch_p - batch), (0, d_in_p - dim_input)))

    w1p = _pad_weight(w1, k_align=BF16_SUBLANE)   # (d_in_p, 128): one exact bf16 tile
    w2p, w3p, w4p = (_pad_weight(w) for w in (w2, w3, w4))
    b1p, b2p, b3p = (_pad_bias(b) for b in (b1, b2, b3))
    # Bake the padded-action mask into the last bias: exp(-1e30 - max) == 0.
    b4p = _pad_bias(b4, pad_value=-1e30)

    const = lambda i: (0, 0)   # weights / biases: VMEM-resident full-array blocks

    out_p = pl.pallas_call(
        _policy_kernel,
        out_shape=jax.ShapeDtypeStruct((batch_p, d_out_p), jnp.bfloat16),
        grid=(batch_p // tb,),
        in_specs=[
            pl.BlockSpec((tb, d_in_p), lambda i: (i, 0)),      # streaming x tile
            pl.BlockSpec(w1p.shape, const), pl.BlockSpec(b1p.shape, const),
            pl.BlockSpec(w2p.shape, const), pl.BlockSpec(b2p.shape, const),
            pl.BlockSpec(w3p.shape, const), pl.BlockSpec(b3p.shape, const),
            pl.BlockSpec(w4p.shape, const), pl.BlockSpec(b4p.shape, const),
        ],
        out_specs=pl.BlockSpec((tb, d_out_p), lambda i: (i, 0)),
        compiler_params=pltpu.CompilerParams(
            dimension_semantics=("parallel",)),   # 2 TCs on v7x; harmless elsewhere
    )(x_p, w1p, b1p, w2p, b2p, w3p, b3p, w4p, b4p)

    # Strip batch/lane padding; tiny slice cast back to f32 to match the reference.
    return out_p[:batch, :dim_output].astype(jnp.float32)


if __name__ == "__main__":
    key = jax.random.PRNGKey(0)
    k_in, k_par = jax.random.split(key)

    # Small shapes consistent with the module: batch=2, input state 4x4 -> dim_input=16
    batch, h, w = 2, 4, 4
    dim_input = h * w
    dim_output = 3

    s_t = jax.random.normal(k_in, (batch, h, w), dtype=jnp.float32)
    params = init_policy_params(k_par, dim_input, dim_output)

    out = policy_forward(s_t, params)
    out = jax.block_until_ready(out)

    # sanity: probabilities sum to ~1 per row (bf16 matmul/store + approx reciprocal)
    assert out.shape == (batch, dim_output)
    assert jnp.all(out >= 0.0)
    assert jnp.allclose(jnp.sum(out, axis=-1), 1.0, atol=2e-2)

    print("KERNEL_OK")
</pallas_src>

<mosaic_0001>
module attributes {stable_mosaic.version = 11 : i64} {
  func.func @_policy_kernel(%arg0: i32, %arg1: memref<16x16xbf16, #tpu.memory_space<vmem>>, %arg2: memref<16x128xbf16, #tpu.memory_space<vmem>>, %arg3: memref<1x128xf32, #tpu.memory_space<vmem>>, %arg4: memref<128x128xbf16, #tpu.memory_space<vmem>>, %arg5: memref<1x128xf32, #tpu.memory_space<vmem>>, %arg6: memref<128x128xbf16, #tpu.memory_space<vmem>>, %arg7: memref<1x128xf32, #tpu.memory_space<vmem>>, %arg8: memref<128x128xbf16, #tpu.memory_space<vmem>>, %arg9: memref<1x128xf32, #tpu.memory_space<vmem>>, %arg10: memref<16x128xbf16, #tpu.memory_space<vmem>>) attributes {dimension_semantics = [#tpu.dimension_semantics<parallel>], iteration_bounds = array<i64: 1>, scalar_prefetch = 0 : i64, scratch_operands = 0 : i64, tpu.core_type = #tpu.core_type<tc>, window_params = [{transform_indices = @transform_0, window_bounds = array<i64: 16, 16>}, {pipeline_mode = #tpu.pipeline_mode<synchronous>, transform_indices = @transform_1, window_bounds = array<i64: 16, 128>}, {pipeline_mode = #tpu.pipeline_mode<synchronous>, transform_indices = @transform_2, window_bounds = array<i64: 1, 128>}, {pipeline_mode = #tpu.pipeline_mode<synchronous>, transform_indices = @transform_3, window_bounds = array<i64: 128, 128>}, {pipeline_mode = #tpu.pipeline_mode<synchronous>, transform_indices = @transform_4, window_bounds = array<i64: 1, 128>}, {pipeline_mode = #tpu.pipeline_mode<synchronous>, transform_indices = @transform_5, window_bounds = array<i64: 128, 128>}, {pipeline_mode = #tpu.pipeline_mode<synchronous>, transform_indices = @transform_6, window_bounds = array<i64: 1, 128>}, {pipeline_mode = #tpu.pipeline_mode<synchronous>, transform_indices = @transform_7, window_bounds = array<i64: 128, 128>}, {pipeline_mode = #tpu.pipeline_mode<synchronous>, transform_indices = @transform_8, window_bounds = array<i64: 1, 128>}, {transform_indices = @transform_9, window_bounds = array<i64: 16, 128>}]} {
    %c0 = arith.constant 0 : index
    %c0_0 = arith.constant 0 : index
    %0 = vector.load %arg1[%c0, %c0_0] : memref<16x16xbf16, #tpu.memory_space<vmem>>, vector<16x16xbf16>
    %c0_1 = arith.constant 0 : index
    %c0_2 = arith.constant 0 : index
    %1 = vector.load %arg2[%c0_1, %c0_2] : memref<16x128xbf16, #tpu.memory_space<vmem>>, vector<16x128xbf16>
    %cst = arith.constant dense<0.000000e+00> : vector<16x128xf32>
    %2 = tpu.matmul %0, %1, %cst {dimension_numbers = #tpu.dot_dimension_numbers<[1], [0], [0], [1], [0, 0, 1, 1], [], []>} : vector<16x16xbf16>, vector<16x128xbf16>, vector<16x128xf32> -> vector<16x128xf32>
    %c0_3 = arith.constant 0 : index
    %c0_4 = arith.constant 0 : index
    %3 = vector.load %arg3[%c0_3, %c0_4] : memref<1x128xf32, #tpu.memory_space<vmem>>, vector<1x128xf32>
    %4 = vector.broadcast %3 : vector<1x128xf32> to vector<16x128xf32>
    %5 = arith.addf %2, %4 : vector<16x128xf32>
    %cst_5 = arith.constant 0.000000e+00 : f32
    %6 = vector.broadcast %cst_5 : f32 to vector<16x128xf32>
    %7 = arith.maximumf %5, %6 : vector<16x128xf32>
    %8 = arith.truncf %7 : vector<16x128xf32> to vector<16x128xbf16>
    %c0_6 = arith.constant 0 : index
    %c0_7 = arith.constant 0 : index
    %9 = vector.load %arg4[%c0_6, %c0_7] : memref<128x128xbf16, #tpu.memory_space<vmem>>, vector<128x128xbf16>
    %cst_8 = arith.constant dense<0.000000e+00> : vector<16x128xf32>
    %10 = tpu.matmul %8, %9, %cst_8 {dimension_numbers = #tpu.dot_dimension_numbers<[1], [0], [0], [1], [0, 0, 1, 1], [], []>} : vector<16x128xbf16>, vector<128x128xbf16>, vector<16x128xf32> -> vector<16x128xf32>
    %c0_9 = arith.constant 0 : index
    %c0_10 = arith.constant 0 : index
    %11 = vector.load %arg5[%c0_9, %c0_10] : memref<1x128xf32, #tpu.memory_space<vmem>>, vector<1x128xf32>
    %12 = vector.broadcast %11 : vector<1x128xf32> to vector<16x128xf32>
    %13 = arith.addf %10, %12 : vector<16x128xf32>
    %cst_11 = arith.constant 0.000000e+00 : f32
    %14 = vector.broadcast %cst_11 : f32 to vector<16x128xf32>
    %15 = arith.maximumf %13, %14 : vector<16x128xf32>
    %16 = arith.truncf %15 : vector<16x128xf32> to vector<16x128xbf16>
    %c0_12 = arith.constant 0 : index
    %c0_13 = arith.constant 0 : index
    %17 = vector.load %arg6[%c0_12, %c0_13] : memref<128x128xbf16, #tpu.memory_space<vmem>>, vector<128x128xbf16>
    %cst_14 = arith.constant dense<0.000000e+00> : vector<16x128xf32>
    %18 = tpu.matmul %16, %17, %cst_14 {dimension_numbers = #tpu.dot_dimension_numbers<[1], [0], [0], [1], [0, 0, 1, 1], [], []>} : vector<16x128xbf16>, vector<128x128xbf16>, vector<16x128xf32> -> vector<16x128xf32>
    %c0_15 = arith.constant 0 : index
    %c0_16 = arith.constant 0 : index
    %19 = vector.load %arg7[%c0_15, %c0_16] : memref<1x128xf32, #tpu.memory_space<vmem>>, vector<1x128xf32>
    %20 = vector.broadcast %19 : vector<1x128xf32> to vector<16x128xf32>
    %21 = arith.addf %18, %20 : vector<16x128xf32>
    %cst_17 = arith.constant 0.000000e+00 : f32
    %22 = vector.broadcast %cst_17 : f32 to vector<16x128xf32>
    %23 = arith.maximumf %21, %22 : vector<16x128xf32>
    %24 = arith.truncf %23 : vector<16x128xf32> to vector<16x128xbf16>
    %c0_18 = arith.constant 0 : index
    %c0_19 = arith.constant 0 : index
    %25 = vector.load %arg8[%c0_18, %c0_19] : memref<128x128xbf16, #tpu.memory_space<vmem>>, vector<128x128xbf16>
    %cst_20 = arith.constant dense<0.000000e+00> : vector<16x128xf32>
    %26 = tpu.matmul %24, %25, %cst_20 {dimension_numbers = #tpu.dot_dimension_numbers<[1], [0], [0], [1], [0, 0, 1, 1], [], []>} : vector<16x128xbf16>, vector<128x128xbf16>, vector<16x128xf32> -> vector<16x128xf32>
    %c0_21 = arith.constant 0 : index
    %c0_22 = arith.constant 0 : index
    %27 = vector.load %arg9[%c0_21, %c0_22] : memref<1x128xf32, #tpu.memory_space<vmem>>, vector<1x128xf32>
    %28 = vector.broadcast %27 : vector<1x128xf32> to vector<16x128xf32>
    %29 = arith.addf %26, %28 : vector<16x128xf32>
    %cst_23 = arith.constant dense<0xFF800000> : vector<16xf32>
    %30 = vector.multi_reduction <maximumf>, %29, %cst_23 [1] : vector<16x128xf32> to vector<16xf32>
    %31 = vector.shape_cast %30 : vector<16xf32> to vector<16x1xf32>
    %32 = vector.broadcast %31 : vector<16x1xf32> to vector<16x128xf32>
    %33 = arith.subf %29, %32 : vector<16x128xf32>
    %34 = math.exp %33 : vector<16x128xf32>
    %cst_24 = arith.constant dense<0.000000e+00> : vector<16xf32>
    %35 = vector.multi_reduction <add>, %34, %cst_24 [1] : vector<16x128xf32> to vector<16xf32>
    %36 = vector.shape_cast %35 : vector<16xf32> to vector<16x1xf32>
    %37 = tpu.reciprocal %36 {approx = true} : vector<16x1xf32> -> vector<16x1xf32>
    %38 = vector.broadcast %37 : vector<16x1xf32> to vector<16x128xf32>
    %39 = arith.mulf %34, %38 : vector<16x128xf32>
    %40 = arith.truncf %39 : vector<16x128xf32> to vector<16x128xbf16>
    %c0_25 = arith.constant 0 : index
    %c0_26 = arith.constant 0 : index
    %41 = vector.load %arg10[%c0_25, %c0_26] : memref<16x128xbf16, #tpu.memory_space<vmem>>, vector<16x128xbf16>
    tpu.vector_store %arg10[%c0_25, %c0_26], %40 {strides = array<i32>} : memref<16x128xbf16, #tpu.memory_space<vmem>>, vector<16x128xbf16>,
    return
  }
  func.func @transform_0(%arg0: i32) -> (i32, i32) {
    %c0_i32 = arith.constant 0 : i32
    %c0_i32_0 = arith.constant 0 : i32
    return %arg0, %c0_i32 : i32, i32
  }
  func.func @transform_1(%arg0: i32) -> (i32, i32) {
    %c0_i32 = arith.constant 0 : i32
    %c0_i32_0 = arith.constant 0 : i32
    %c0_i32_1 = arith.constant 0 : i32
    return %c0_i32, %c0_i32_0 : i32, i32
  }
  func.func @transform_2(%arg0: i32) -> (i32, i32) {
    %c0_i32 = arith.constant 0 : i32
    %c0_i32_0 = arith.constant 0 : i32
    %c0_i32_1 = arith.constant 0 : i32
    return %c0_i32, %c0_i32_0 : i32, i32
  }
  func.func @transform_3(%arg0: i32) -> (i32, i32) {
    %c0_i32 = arith.constant 0 : i32
    %c0_i32_0 = arith.constant 0 : i32
    %c0_i32_1 = arith.constant 0 : i32
    return %c0_i32, %c0_i32_0 : i32, i32
  }
  func.func @transform_4(%arg0: i32) -> (i32, i32) {
    %c0_i32 = arith.constant 0 : i32
    %c0_i32_0 = arith.constant 0 : i32
    %c0_i32_1 = arith.constant 0 : i32
    return %c0_i32, %c0_i32_0 : i32, i32
  }
  func.func @transform_5(%arg0: i32) -> (i32, i32) {
    %c0_i32 = arith.constant 0 : i32
    %c0_i32_0 = arith.constant 0 : i32
    %c0_i32_1 = arith.constant 0 : i32
    return %c0_i32, %c0_i32_0 : i32, i32
  }
  func.func @transform_6(%arg0: i32) -> (i32, i32) {
    %c0_i32 = arith.constant 0 : i32
    %c0_i32_0 = arith.constant 0 : i32
    %c0_i32_1 = arith.constant 0 : i32
    return %c0_i32, %c0_i32_0 : i32, i32
  }
  func.func @transform_7(%arg0: i32) -> (i32, i32) {
    %c0_i32 = arith.constant 0 : i32
    %c0_i32_0 = arith.constant 0 : i32
    %c0_i32_1 = arith.constant 0 : i32
    return %c0_i32, %c0_i32_0 : i32, i32
  }
  func.func @transform_8(%arg0: i32) -> (i32, i32) {
    %c0_i32 = arith.constant 0 : i32
    %c0_i32_0 = arith.constant 0 : i32
    %c0_i32_1 = arith.constant 0 : i32
    return %c0_i32, %c0_i32_0 : i32, i32
  }
  func.func @transform_9(%arg0: i32) -> (i32, i32) {
    %c0_i32 = arith.constant 0 : i32
    %c0_i32_0 = arith.constant 0 : i32
    return %arg0, %c0_i32 : i32, i32
  }
}

</mosaic_0001>

<bundles_post_ra>
// kernel: tpu_custom_call.1
= control target key start
LH: loop header
LB: loop body
LE: loop exit
PB: predicated region body
PF: predicated region fallthrough
CT: control target
= control target key end

     0   :  { %14 = vsyncpa [#allocation3], 0  ;;  %s1089_s0 = inlined_call_operand.hbm [shape: bf16[16,16], index: 0, kind: input, shape index: {}]   ;;  %s1090_s1 = inlined_call_operand.hbm [shape: bf16[16,128], index: 1, kind: input, shape index: {}]   ;;  %s1091_s2 = inlined_call_operand.vmem [shape: f32[1,128], index: 2, kind: input, shape index: {}]   ;;  %s1092_s3 = inlined_call_operand.hbm [shape: bf16[128,128], index: 3, kind: input, shape index: {}]   ;;  %s1093_s4 = inlined_call_operand.vmem [shape: f32[1,128], index: 4, kind: input, shape index: {}]   ;;  %s1094_s5 = inlined_call_operand.hbm [shape: bf16[128,128], index: 5, kind: input, shape index: {}]   ;;  %s1095_s6 = inlined_call_operand.vmem [shape: f32[1,128], index: 6, kind: input, shape index: {}]   ;;  %s1096_s7 = inlined_call_operand.hbm [shape: bf16[128,128], index: 7, kind: input, shape index: {}]   ;;  %s1097_s8 = inlined_call_operand.vmem [shape: f32[1,128], index: 8, kind: input, shape index: {}]   ;;  %s1098_s9 = inlined_call_operand.hbm [shape: bf16[16,128], index: 9, kind: output, shape index: {}]  }
   0x1   :  { %15 = vsyncpa [#allocation6], 0 }
   0x2   :  { %16 = vsyncpa [#allocation9], 0 }
   0x3   :  { %17 = vsyncpa [#allocation4], 0  ;;  %s880_s30 = smov [#allocation5]   ;;  %s881_s11 = smov [#allocation8]  }
   0x4   :  { %s35_s10 = sshll.u32 %s880_s30, 4  ;;  %s63_s12 = sshll.u32 %s881_s11, 4  ;;  %s36_s10 = int_to_ptr.vmem [resolvable:$true] %s35_s10  ;;  %s940_s12 = int_to_ptr.vmem [resolvable:$true] %s63_s12 }
   0x5   :  { %s740_s15 = scalar_lea.hbm %s1090_s1, 128 }
   0x6   :  { %p741_p0 = scmp.ne.s32.totalorder %s1090_s1, %s740_s15  ;;  %p744_p1 = scmp.lt.u32.totalorder %s740_s15, %s1090_s1 }
   0x8   :  { %p746_p2 = pnand %p744_p1, %p741_p0 }
   0xa   :  { %749 = shalt.err (!%p746_p2)
}
   0xb   :  { %s750_s20 = scalar_lea.vmem %s36_s10, 128  ;;  %p755_p4 = scmp.lt.s32.totalorder %s36_s10, %s36_s10 }
   0xc   :  { %p751_p3 = scmp.ne.s32.totalorder %s36_s10, %s750_s20  ;;  %p756_p5 = scmp.lt.s32.totalorder %s750_s20, %s750_s20 }
   0xe   :  { %p757_p6 = por %p756_p5, %p755_p4 }
  0x10   :  { %p758_p7 = pnand %p757_p6, %p751_p3 }
  0x12   :  { %761 = shalt.err (!%p758_p7)
}
  0x13   :  { %s882_s21 = smov 64   ;;  %s883_s22 = smov 4  }
  0x14   :  { %41 = dma.hbm_to_vmem [thread:$0]  %s1090_s1, 128, %s36_s10, [#allocation6], %s882_s21, %s882_s21, %s883_s22  }
  0x15   :  { %s762_s27 = scalar_lea.hbm %s1094_s5, 1024 }
  0x16   :  { %p763_p8 = scmp.ne.s32.totalorder %s1094_s5, %s762_s27  ;;  %p766_p9 = scmp.lt.u32.totalorder %s762_s27, %s1094_s5 }
  0x18   :  { %p768_p10 = pnand %p766_p9, %p763_p8 }
  0x1a   :  { %771 = shalt.err (!%p768_p10)
}
  0x1b   :  { %s772_s13 = scalar_lea.vmem %s940_s12, 1024  ;;  %p777_p12 = scmp.lt.s32.totalorder %s940_s12, %s940_s12 }
  0x1c   :  { %p773_p11 = scmp.ne.s32.totalorder %s940_s12, %s772_s13  ;;  %p778_p13 = scmp.lt.s32.totalorder %s772_s13, %s772_s13 }
  0x1e   :  { %p779_p0 = por %p778_p13, %p777_p12 }
  0x20   :  { %p780_p1 = pnand %p779_p0, %p773_p11 }
  0x22   :  { %783 = shalt.err (!%p780_p1)
}
  0x23   :  { %69 = dma.hbm_to_vmem [thread:$0]  %s1094_s5, 1024, %s940_s12, [#allocation9], %s882_s21, %s882_s21, %s883_s22  }
  0x24   :  { %s884_s14 = smov [#allocation2]   ;;  %s885_s16 = smov [#allocation7]  }
  0x25   :  { %s23_s15 = sshll.u32 %s884_s14, 4  ;;  %s49_s17 = sshll.u32 %s885_s16, 4  ;;  %s24_s15 = int_to_ptr.vmem [resolvable:$true] %s23_s15  ;;  %s977_s17 = int_to_ptr.vmem [resolvable:$true] %s49_s17 }
  0x26   :  { %s784_s20 = scalar_lea.hbm %s1089_s0, 128 }
  0x27   :  { %p785_p2 = scmp.ne.s32.totalorder %s1089_s0, %s784_s20  ;;  %p788_p3 = scmp.lt.u32.totalorder %s784_s20, %s1089_s0 }
  0x29   :  { %p790_p4 = pnand %p788_p3, %p785_p2 }
  0x2b   :  { %793 = shalt.err (!%p790_p4)
}
  0x2c   :  { %s794_s5 = scalar_lea.vmem %s24_s15, 128  ;;  %p799_p6 = scmp.lt.s32.totalorder %s24_s15, %s24_s15 }
  0x2d   :  { %p795_p5 = scmp.ne.s32.totalorder %s24_s15, %s794_s5  ;;  %p800_p7 = scmp.lt.s32.totalorder %s794_s5, %s794_s5 }
  0x2f   :  { %p801_p8 = por %p800_p7, %p799_p6 }
  0x31   :  { %p802_p9 = pnand %p801_p8, %p795_p5 }
  0x33   :  { %805 = shalt.err (!%p802_p9)
}
  0x34   :  { %29 = dma.hbm_to_vmem [thread:$0]  %s1089_s0, 128, %s24_s15, [#allocation3], %s882_s21, %s882_s21, %s883_s22  }
  0x35   :  { %s806_s30 = scalar_lea.hbm %s1092_s3, 1024 }
  0x36   :  { %p807_p10 = scmp.ne.s32.totalorder %s1092_s3, %s806_s30  ;;  %p810_p11 = scmp.lt.u32.totalorder %s806_s30, %s1092_s3 }
  0x38   :  { %p812_p12 = pnand %p810_p11, %p807_p10 }
  0x3a   :  { %815 = shalt.err (!%p812_p12)
}
  0x3b   :  { %s816_s14 = scalar_lea.vmem %s977_s17, 1024  ;;  %p821_p0 = scmp.lt.s32.totalorder %s977_s17, %s977_s17 }
  0x3c   :  { %p817_p13 = scmp.ne.s32.totalorder %s977_s17, %s816_s14  ;;  %p822_p1 = scmp.lt.s32.totalorder %s816_s14, %s816_s14 }
  0x3e   :  { %p823_p2 = por %p822_p1, %p821_p0 }
  0x40   :  { %p824_p3 = pnand %p823_p2, %p817_p13 }
  0x42   :  { %827 = shalt.err (!%p824_p3)
}
  0x43   :  { %55 = dma.hbm_to_vmem [thread:$0]  %s1092_s3, 1024, %s977_s17, [#allocation6], %s882_s21, %s882_s21, %s883_s22  }
  0x44   :  { %s886_s16 = smov [#allocation10]   ;;  %s828_s23 = scalar_lea.hbm %s1096_s7, 1024 }
  0x45   :  { %s77_s18 = sshll.u32 %s886_s16, 4  ;;  %p829_p4 = scmp.ne.s32.totalorder %s1096_s7, %s828_s23  ;;  %s78_s18 = int_to_ptr.vmem [resolvable:$true] %s77_s18 }
  0x46   :  { %p832_p5 = scmp.lt.u32.totalorder %s828_s23, %s1096_s7 }
  0x48   :  { %p834_p6 = pnand %p832_p5, %p829_p4 }
  0x4a   :  { %837 = shalt.err (!%p834_p6)
}
  0x4b   :  { %s838_s12 = scalar_lea.vmem %s78_s18, 1024  ;;  %p843_p8 = scmp.lt.s32.totalorder %s78_s18, %s78_s18 }
  0x4c   :  { %p839_p7 = scmp.ne.s32.totalorder %s78_s18, %s838_s12  ;;  %p844_p9 = scmp.lt.s32.totalorder %s838_s12, %s838_s12 }
  0x4e   :  { %p845_p10 = por %p844_p9, %p843_p8 }
  0x50   :  { %p846_p11 = pnand %p845_p10, %p839_p7 }
  0x52   :  { %849 = shalt.err (!%p846_p11)
}
  0x53   :  { %83 = dma.hbm_to_vmem [thread:$0]  %s1096_s7, 1024, %s78_s18, [#allocation9], %s882_s21, %s882_s21, %s883_s22  }
  0x54   :  { %872 = dma.done.wait [#allocation3], 128  }
  0x55   :  { %873 = vsyncadd [#allocation3], 4294967168 }
  0x56   :  { %874 = dma.done.wait [#allocation6], 1152  }
  0x57   :  { %875 = vsyncadd [#allocation6], 4294966144 }
  0x58   :  { %876 = dma.done.wait [#allocation9], 2048  }
  0x59   :  { %877 = vsyncadd [#allocation9], 4294965248  ;;  %v887_v0 = vmov 0.0   ;;  %vm888_vm0 = vmmov 0   ;;  %v706_v1 = vld [vmem:[#allocation5] sm:$0xff]   ;;  %v707_v2 = vld [vmem:[#allocation2] sm:$0xff]  }
  0x5a   :  { %630 = vmatprep.subr.bf16.mxu0 %v887_v0  ;;  %632 = vmatprep.mubr.msk.bf16.mxu0 %vm888_vm0, %v887_v0  ;;  %vm124_vm1 = vcmask 130048   ;;  %v708_v3 = vld [vmem:[#allocation7] sm:$0xff]   ;;  %v709_v4 = vld [vmem:[#allocation7 + $0x8] sm:$0xff]   ;;  %v710_v5 = vld [vmem:[#allocation7 + $0x10] sm:$0xff]  }
  0x5b   :  { %636 = vmatprep.subr.bf16.mxu1 %v887_v0  ;;  %652 = vmatprep.mubr.msk.bf16.mxu1 %vm888_vm0, %v887_v0  ;;  %v711_v6 = vld [vmem:[#allocation7 + $0x18] sm:$0xff]   ;;  %v712_v7 = vld [vmem:[#allocation7 + $0x20] sm:$0xff]   ;;  %v713_v8 = vld [vmem:[#allocation7 + $0x28] sm:$0xff]  }
  0x5c   :  { %631 = vmatpush3.bf16.msra.mxu0 %v706_v1  ;;  %637 = vmatpush3.bf16.msra.mxu1 %v708_v3  ;;  %v714_v9 = vld [vmem:[#allocation7 + $0x30] sm:$0xff]   ;;  %v715_v10 = vld [vmem:[#allocation7 + $0x38] sm:$0xff]   ;;  %v716_v11 = vld [vmem:[#allocation8] sm:$0xff]  }
  0x5d   :  { %656 = vmatprep.subr.bf16.mxu0 %v887_v0  ;;  %638 = vmatprep.subr.bf16.mxu1 %v887_v0  ;;  %v717_v12 = vld [vmem:[#allocation8 + $0x8] sm:$0xff]   ;;  %v718_v13 = vld [vmem:[#allocation8 + $0x10] sm:$0xff]   ;;  %v719_v14 = vld [vmem:[#allocation8 + $0x18] sm:$0xff]  }
  0x5e   :  { %v720_v15 = vld [vmem:[#allocation8 + $0x20] sm:$0xff]   ;;  %v721_v16 = vld [vmem:[#allocation8 + $0x28] sm:$0xff]   ;;  %v561_v17 = vld [vmem:[%s1091_s2] ss:$0 sm:$0xff] }
  0x5f   :  { %633 = vmatmul.mubr.msk.bf16.vlgmr.msra.gmra.mrb[0].mxu0 %vm124_vm1, %v707_v2  ;;  %v722_v27 = vld [vmem:[#allocation8 + $0x30] sm:$0xff]   ;;  %v723_v28 = vld [vmem:[#allocation8 + $0x38] sm:$0xff]   ;;  %v724_v29 = vld [vmem:[#allocation10] sm:$0xff]  }
  0x60   :  { %672 = vmatprep.mubr.msk.bf16.mxu0 %vm888_vm0, %v887_v0  ;;  %639 = vmatpush3.bf16.msra.mxu1 %v709_v4  ;;  %v725_v30 = vld [vmem:[#allocation10 + $0x8] sm:$0xff]   ;;  %v726_v31 = vld [vmem:[#allocation10 + $0x10] sm:$0xff]   ;;  %v727_v32 = vld [vmem:[#allocation10 + $0x18] sm:$0xff]  }
  0x61   :  { %640 = vmatprep.subr.bf16.mxu1 %v887_v0  ;;  %657 = vmatpush3.bf16.msra.mxu0 %v716_v11  ;;  %v728_v33 = vld [vmem:[#allocation10 + $0x20] sm:$0xff]   ;;  %v729_v34 = vld [vmem:[#allocation10 + $0x28] sm:$0xff]   ;;  %v565_v35 = vld [vmem:[%s1093_s4] ss:$0 sm:$0xff] }
  0x62   :  { %658 = vmatprep.subr.bf16.mxu0 %v887_v0  ;;  %v730_v45 = vld [vmem:[#allocation10 + $0x30] sm:$0xff]   ;;  %v731_v46 = vld [vmem:[#allocation10 + $0x38] sm:$0xff]  }
  0x63   :  { %v574_v47 = vld [vmem:[%s1095_s6] ss:$0 sm:$0xff]  ;;  %s889_s6 = smov [#allocation11]  }
  0x64   :  { %641 = vmatpush3.bf16.msra.mxu1 %v710_v5  ;;  %v583_v57 = vld [vmem:[%s1097_s8] ss:$0 sm:$0xff]  ;;  %s547_s8 = sshll.u32 %s889_s6, 4  ;;  %s548_s8 = int_to_ptr.vmem [resolvable:$true] %s547_s8 }
  0x65   :  { %642 = vmatprep.subr.bf16.mxu1 %v887_v0  ;;  %659 = vmatpush3.bf16.msra.mxu0 %v717_v12  ;;  %s850_s13 = scalar_lea.vmem %s548_s8, 128  ;;  %p855_p13 = scmp.lt.s32.totalorder %s548_s8, %s548_s8 }
  0x66   :  { %660 = vmatprep.subr.bf16.mxu0 %v887_v0  ;;  %p851_p12 = scmp.ne.s32.totalorder %s548_s8, %s850_s13  ;;  %p856_p0 = scmp.lt.s32.totalorder %s850_s13, %s850_s13 }
  0x68   :  { %643 = vmatpush3.bf16.msra.mxu1 %v711_v6  ;;  %p857_p1 = por %p856_p0, %p855_p13 }
  0x69   :  { %644 = vmatprep.subr.bf16.mxu1 %v887_v0  ;;  %661 = vmatpush3.bf16.msra.mxu0 %v718_v13 }
  0x6a   :  { %662 = vmatprep.subr.bf16.mxu0 %v887_v0  ;;  %p858_p2 = pnand %p857_p1, %p851_p12 }
  0x6c   :  { %645 = vmatpush3.bf16.msra.mxu1 %v712_v7 }
  0x6d   :  { %646 = vmatprep.subr.bf16.mxu1 %v887_v0  ;;  %663 = vmatpush3.bf16.msra.mxu0 %v719_v14 }
  0x6e   :  { %664 = vmatprep.subr.bf16.mxu0 %v887_v0 }
  0x70   :  { %647 = vmatpush3.bf16.msra.mxu1 %v713_v8 }
  0x71   :  { %648 = vmatprep.subr.bf16.mxu1 %v887_v0  ;;  %665 = vmatpush3.bf16.msra.mxu0 %v720_v15 }
  0x72   :  { %666 = vmatprep.subr.bf16.mxu0 %v887_v0 }
  0x74   :  { %649 = vmatpush3.bf16.msra.mxu1 %v714_v9 }
  0x75   :  { %650 = vmatprep.subr.bf16.mxu1 %v887_v0  ;;  %667 = vmatpush3.bf16.msra.mxu0 %v721_v16 }
  0x76   :  { %668 = vmatprep.subr.bf16.mxu0 %v887_v0 }
  0x78   :  { %651 = vmatpush3.bf16.msra.mxu1 %v715_v10 }
  0x79   :  { %676 = vmatprep.subr.bf16.mxu1 %v887_v0  ;;  %669 = vmatpush3.bf16.msra.mxu0 %v722_v27 }
  0x7a   :  { %670 = vmatprep.subr.bf16.mxu0 %v887_v0 }
  0x7d   :  { %671 = vmatpush3.bf16.msra.mxu0 %v723_v28 }
 0x132   :  { %v162_v18 = vpop.f32.mrb[0].mxu0 }
 0x133   :  { %v163_v19 = vadd.f32 %v561_v17, %v162_v18  ;;  %v634_v20 = vpop.f32.mrb[1].mxu0 }
 0x134   :  { %v165_v21 = vpop.f32.mrb[2].mxu0 }
 0x135   :  { %v166_v22 = vadd.f32 %v561_v17, %v165_v21  ;;  %v635_v23 = vpop.f32.mrb[3].mxu0  ;;  %v169_v24 = vmax.f32 %v163_v19, 0.0 }
 0x137   :  { %v170_v25 = vmax.f32 %v166_v22, 0.0 }
 0x139   :  { %v171_v26 = vpack.c.bf16 %v170_v25, %v169_v24 }
 0x13b   :  { %653 = vmatmul.mubr.bf16.vlgmr.msra.gmra.mrb[0].mxu1 %v171_v26 }
 0x13c   :  { %692 = vmatprep.mubr.msk.bf16.mxu1 %vm888_vm0, %v887_v0  ;;  %677 = vmatpush3.bf16.msra.mxu1 %v724_v29 }
 0x13d   :  { %678 = vmatprep.subr.bf16.mxu1 %v887_v0 }
 0x140   :  { %679 = vmatpush3.bf16.msra.mxu1 %v725_v30 }
 0x141   :  { %680 = vmatprep.subr.bf16.mxu1 %v887_v0 }
 0x144   :  { %681 = vmatpush3.bf16.msra.mxu1 %v726_v31 }
 0x145   :  { %682 = vmatprep.subr.bf16.mxu1 %v887_v0 }
 0x148   :  { %683 = vmatpush3.bf16.msra.mxu1 %v727_v32 }
 0x149   :  { %684 = vmatprep.subr.bf16.mxu1 %v887_v0 }
 0x14c   :  { %685 = vmatpush3.bf16.msra.mxu1 %v728_v33 }
 0x14d   :  { %686 = vmatprep.subr.bf16.mxu1 %v887_v0 }
 0x150   :  { %687 = vmatpush3.bf16.msra.mxu1 %v729_v34 }
 0x151   :  { %688 = vmatprep.subr.bf16.mxu1 %v887_v0 }
 0x154   :  { %689 = vmatpush3.bf16.msra.mxu1 %v730_v45 }
 0x155   :  { %690 = vmatprep.subr.bf16.mxu1 %v887_v0 }
 0x158   :  { %691 = vmatpush3.bf16.msra.mxu1 %v731_v46 }
 0x20e   :  { %v277_v36 = vpop.f32.mrb[0].mxu1 }
 0x20f   :  { %v278_v37 = vadd.f32 %v565_v35, %v277_v36  ;;  %v654_v38 = vpop.f32.mrb[1].mxu1 }
 0x210   :  { %v280_v39 = vpop.f32.mrb[2].mxu1 }
 0x211   :  { %v281_v40 = vadd.f32 %v565_v35, %v280_v39  ;;  %v655_v41 = vpop.f32.mrb[3].mxu1  ;;  %v284_v42 = vmax.f32 %v278_v37, 0.0 }
 0x213   :  { %v285_v43 = vmax.f32 %v281_v40, 0.0 }
 0x215   :  { %v286_v44 = vpack.c.bf16 %v285_v43, %v284_v42 }
 0x217   :  { %673 = vmatmul.mubr.bf16.vlgmr.msra.gmra.mrb[4].mxu0 %v286_v44 }
 0x2ea   :  { %v392_v48 = vpop.f32.mrb[4].mxu0 }
 0x2eb   :  { %v393_v49 = vadd.f32 %v574_v47, %v392_v48  ;;  %v674_v50 = vpop.f32.mrb[5].mxu0 }
 0x2ec   :  { %v395_v51 = vpop.f32.mrb[6].mxu0 }
 0x2ed   :  { %v396_v52 = vadd.f32 %v574_v47, %v395_v51  ;;  %v675_v53 = vpop.f32.mrb[7].mxu0  ;;  %v399_v54 = vmax.f32 %v393_v49, 0.0 }
 0x2ef   :  { %v400_v55 = vmax.f32 %v396_v52, 0.0 }
 0x2f1   :  { %v401_v56 = vpack.c.bf16 %v400_v55, %v399_v54 }
 0x2f3   :  { %693 = vmatmul.mubr.bf16.vlgmr.msra.gmra.mrb[4].mxu1 %v401_v56 }
 0x3c6   :  { %v507_v58 = vpop.f32.mrb[4].mxu1 }
 0x3c7   :  { %v508_v59 = vadd.f32 %v583_v57, %v507_v58  ;;  %v694_v60 = vpop.f32.mrb[5].mxu1 }
 0x3c8   :  { %v510_v61 = vpop.f32.mrb[6].mxu1 }
 0x3c9   :  { %514 = vmax.xlane.f32.xlu0 %v508_v59  ;;  %v695_v62 = vpop.f32.mrb[7].mxu1  ;;  %v511_v63 = vadd.f32 %v583_v57, %v510_v61 }
 0x3cd   :  { %516 = vmax.xlane.f32.xlu0 %v511_v63 }
 0x456   :  { %v515_v0 = vpop.xlane.xlu0 %514 }
 0x457   :  { %v518_v1 = vsub.f32 %v508_v59, %v515_v0 }
 0x459   :  { %v520_v2 = vmul.f32 1.442695, %v518_v1 }
 0x45a   :  { %v517_v3 = vpop.xlane.xlu0 %516 }
 0x45b   :  { %732 = vpow2.f32 %v520_v2  ;;  %v519_v4 = vsub.f32 %v511_v63, %v517_v3 }
 0x45d   :  { %v522_v5 = vmul.f32 1.442695, %v519_v4 }
 0x45f   :  { %734 = vpow2.f32 %v522_v5 }
 0x465   :  { %v733_v6 = vpop.eup %732 }
 0x466   :  { %524 = vadd.xlane.f32.xlu1 %v733_v6 }
 0x469   :  { %v735_v7 = vpop.eup %734 }
 0x46a   :  { %526 = vadd.xlane.f32.xlu1 %v735_v7 }
 0x4f3   :  { %v525_v8 = vpop.xlane.xlu1 %524 }
 0x4f4   :  { %736 = vrcp.f32 %v525_v8 }
 0x4f7   :  { %v527_v9 = vpop.xlane.xlu1 %526 }
 0x4f8   :  { %738 = vrcp.f32 %v527_v9 }
 0x4fe   :  { %v737_v10 = vpop.eup %736 }
 0x4ff   :  { %v530_v12 = vmul.f32 %v737_v10, %v733_v6 }
 0x502   :  { %v739_v11 = vpop.eup %738 }
 0x503   :  { %v531_v13 = vmul.f32 %v739_v11, %v735_v7 }
 0x505   :  { %v599_v14 = vpack.c.bf16 %v531_v13, %v530_v12 }
 0x507   :  { %600 = vst [vmem:[#allocation11] sm:$0xff] %v599_v14  }
 0x508   :  { %861 = shalt.err (!%p858_p2)
}
 0x509   :  { %s862_s14 = scalar_lea.hbm %s1098_s9, 128 }
 0x50a   :  { %p863_p3 = scmp.ne.s32.totalorder %s1098_s9, %s862_s14  ;;  %p866_p4 = scmp.lt.u32.totalorder %s862_s14, %s1098_s9 }
 0x50c   :  { %p868_p5 = pnand %p866_p4, %p863_p3 }
 0x50e   :  { %871 = shalt.err (!%p868_p5)
}
 0x50f   :  { %553 = dma.vmem_to_hbm [thread:$0]  %s548_s8, 128, %s1098_s9, [#allocation4], %s882_s21, %s882_s21, %s883_s22  }
 0x510   :  { %878 = dma.done.wait [#allocation4], 128  }
 0x511   :  { %879 = vsyncadd [#allocation4], 4294967168 }
 0x512   :  { %557 = vsyncpa [#allocation3], 1 }
 0x513   :  { %558 = vsyncpa [#allocation6], 1 }
 0x514   :  { %559 = vsyncpa [#allocation9], 1 }
 0x515   :  { %560 = vsyncpa [#allocation4], 1 }

</bundles_post_ra>
